<compile_context>
chip_gen: v7x
topology: tpu7x:2x2x1
jax: 0.10.0
libtpu: 0.0.40
codegen_flags: <defaults>
</compile_context>

<pallas_src>
import functools

import jax
import jax.numpy as jnp
from jax.experimental import pallas as pl
from jax.experimental.pallas import tpu as pltpu


_LANES = 512                              # lane width of the streamed 2-D layout
_SLAB_ROWS = 8                            # rows per inner-loop slab (= sublanes)
_UNROLL = 8                               # manual unroll factor of the slab loop
_NUM_SPLITS = 2                           # leading "parallel" grid axis
_TARGET_BLOCK_BYTES = 4 * 1024 * 1024     # ~4 MiB per input per pipeline buffer
_VMEM_LIMIT_BYTES = 40 * 1024 * 1024


def _cdiv(a, b):
    return -(-a // b)


def _sums_jax(x, y):
    """Six global sums in plain JAX (tiny inputs / sub-row tails only)."""
    x = x.astype(jnp.float32)
    y = y.astype(jnp.float32)
    d = x - y
    return jnp.stack([jnp.sum(x * y), jnp.sum(x), jnp.sum(y),
                      jnp.sum(x * x), jnp.sum(y * y), jnp.sum(d * d)])


def _sums_kernel(x_ref, y_ref, acc_ref, *, rows, block_rows, nb_per_split,
                 needs_mask):
    """Accumulates six running sums into a resident (6, 8, _LANES) f32 block.

    acc[0]=sum(x*y)  acc[1]=sum(x)   acc[2]=sum(y)
    acc[3]=sum(x*x)  acc[4]=sum(y*y) acc[5]=sum((x-y)^2)
    """
    p = pl.program_id(0)
    j = pl.program_id(1)

    @pl.when(j == 0)
    def _init():
        acc_ref[...] = jnp.zeros_like(acc_ref)

    # Unclamped global block index.  The index_map clamps the DMA separately,
    # so the (rare) out-of-range steps of the last split re-read a valid block
    # and this kernel masks their contribution to exactly zero.
    b = p * nb_per_split + j
    valid_rows = rows - b * block_rows          # <= 0 for out-of-range steps

    if needs_mask:
        row_iota = jax.lax.broadcasted_iota(jnp.int32, (_SLAB_ROWS, _LANES), 0)

    def slab_update(idx, carry):
        a_xy, a_x, a_y, a_x2, a_y2, a_d2 = carry
        start = idx * _SLAB_ROWS
        if not isinstance(start, int):
            start = pl.multiple_of(start, _SLAB_ROWS)
        x = x_ref[pl.ds(start, _SLAB_ROWS), :].astype(jnp.float32)
        y = y_ref[pl.ds(start, _SLAB_ROWS), :].astype(jnp.float32)
        if needs_mask:
            m = row_iota < (valid_rows - idx * _SLAB_ROWS)
            x = jnp.where(m, x, 0.0)            # zero both -> all six sums keep
            y = jnp.where(m, y, 0.0)            # ignoring garbage rows
        d = x - y
        return (a_xy + x * y, a_x + x, a_y + y,
                a_x2 + x * x, a_y2 + y * y, a_d2 + d * d)

    num_slabs = block_rows // _SLAB_ROWS
    num_groups, rem_slabs = divmod(num_slabs, _UNROLL)

    def group_body(g, carry):
        base = g * _UNROLL
        for u in range(_UNROLL):                # static: manual 8-way unroll
            carry = slab_update(base + u, carry)
        return carry

    zero = jnp.zeros((_SLAB_ROWS, _LANES), jnp.float32)
    carry = (zero, zero, zero, zero, zero, zero)
    if num_groups > 0:
        carry = jax.lax.fori_loop(0, num_groups, group_body, carry)
    for u in range(rem_slabs):                  # static remainder (< _UNROLL)
        carry = slab_update(num_groups * _UNROLL + u, carry)

    acc_ref[0] += carry[0]
    acc_ref[1] += carry[1]
    acc_ref[2] += carry[2]
    acc_ref[3] += carry[3]
    acc_ref[4] += carry[4]
    acc_ref[5] += carry[5]


def _reduce_sums(x, y):
    """Six global f32 sums over all elements of x / y (same shapes)."""
    assert x.shape == y.shape, (x.shape, y.shape)
    total = x.size
    xf = x.reshape(-1)
    yf = y.reshape(-1)

    rows = total // _LANES
    rem = total - rows * _LANES

    if rows < _SLAB_ROWS:
        # Tiny input (< 8*512 + 512 elements): plain JAX, no kernel needed.
        return _sums_jax(xf, yf)

    tail = jnp.zeros((6,), jnp.float32)
    if rem:
        # Sub-row element tail (< _LANES elements) summed in plain JAX.
        tail = _sums_jax(xf[rows * _LANES:], yf[rows * _LANES:])
        # NOTE: only taken when total % 512 != 0; the prefix slice may cost one
        # extra HBM pass.  For lane-aligned inputs the reshape below is free.
        xf = xf[: rows * _LANES]
        yf = yf[: rows * _LANES]

    x2 = xf.reshape(rows, _LANES)
    y2 = yf.reshape(rows, _LANES)

    itemsize = max(x.dtype.itemsize, y.dtype.itemsize)
    max_block_rows = max(_SLAB_ROWS, _TARGET_BLOCK_BYTES // (_LANES * itemsize))
    max_block_rows -= max_block_rows % _SLAB_ROWS
    # block_rows is a multiple of 8 and never exceeds rows, so every block's
    # DMA starts in bounds; only the last (ragged) block needs masking.
    block_rows = min(max_block_rows, (rows // _SLAB_ROWS) * _SLAB_ROWS)

    nb_total = _cdiv(rows, block_rows)
    num_splits = min(_NUM_SPLITS, nb_total)
    nb_per_split = _cdiv(nb_total, num_splits)
    needs_mask = (rows % block_rows != 0) or (num_splits * nb_per_split != nb_total)
    last_block = nb_total - 1

    def in_index_map(p, j):
        # Clamp so out-of-range steps of the last split still DMA in bounds;
        # the kernel zeroes their contribution via the unclamped index.
        return (jnp.minimum(p * nb_per_split + j, last_block), 0)

    in_spec = pl.BlockSpec((block_rows, _LANES), in_index_map)
    kernel = functools.partial(_sums_kernel, rows=rows, block_rows=block_rows,
                               nb_per_split=nb_per_split, needs_mask=needs_mask)

    partials = pl.pallas_call(
        kernel,
        out_shape=jax.ShapeDtypeStruct((num_splits, 6, _SLAB_ROWS, _LANES),
                                       jnp.float32),
        grid=(num_splits, nb_per_split),
        in_specs=[in_spec, in_spec],
        out_specs=pl.BlockSpec((None, 6, _SLAB_ROWS, _LANES),
                               lambda p, j: (p, 0, 0, 0)),
        compiler_params=pltpu.CompilerParams(
            # On v7x, switch the first axis to pltpu.CORE_PARALLEL after
            # verifying in xprof; kept "parallel" here for 1-core portability.
            dimension_semantics=("parallel", "arbitrary"),
            vmem_limit_bytes=_VMEM_LIMIT_BYTES,
        ),
    )(x2, y2)

    # Tiny (num_splits, 6, 8, 512) cross-lane reduce done once in plain JAX.
    return tail + jnp.sum(partials, axis=(0, 2, 3))


@functools.partial(jax.jit, static_argnames=("alph",))
def my_loss(inp, target, alph):
    """Equivalent of MyLoss(alph).forward(input, target)."""
    n = inp.shape[0]                          # matches torch `input.size()[0]`
    s = _reduce_sums(inp, target)
    sum_xy, sum_x, sum_y, sum_x2, sum_y2, sse = (s[i] for i in range(6))
    nf = jnp.float32(n)
    pcc = (nf * sum_xy - sum_x * sum_y) / jnp.sqrt(
        (nf * sum_x2 - sum_x * sum_x) * (nf * sum_y2 - sum_y * sum_y))
    mse = sse / jnp.float32(inp.size)         # F.mse_loss: mean over all elems
    a = jnp.float32(alph)
    return a * (1.0 - jnp.abs(pcc)) + (1.0 - a) * mse


def _reference(inp, target, alph):
    """Pure-JAX reference mirroring the PyTorch forward, for sanity checking."""
    x = inp.astype(jnp.float32)
    y = target.astype(jnp.float32)
    sum_xy = jnp.sum(x * y)
    sum_x = jnp.sum(x)
    sum_y = jnp.sum(y)
    sum_x2 = jnp.sum(x * x)
    sum_y2 = jnp.sum(y * y)
    n = jnp.float32(inp.shape[0])
    pcc = (n * sum_xy - sum_x * sum_y) / jnp.sqrt(
        (n * sum_x2 - sum_x * sum_x) * (n * sum_y2 - sum_y * sum_y))
    mse = jnp.mean((x - y) ** 2)
    return alph * (1.0 - jnp.abs(pcc)) + (1.0 - alph) * mse


if __name__ == "__main__":
    key = jax.random.PRNGKey(0)
    alph = 0.5
    cases = [
        ((2, 4, 32, 32), jnp.float32),   # 8192 elems: lane-aligned kernel path
        ((3, 5, 40, 40), jnp.float32),   # 24000 elems: ragged rows + elem tail
        ((2, 4, 32, 32), jnp.bfloat16),  # native bf16 streaming
        ((2, 4, 16, 16), jnp.float32),   # tiny input: pure-JAX fallback path
    ]
    for i, (shape, dtype) in enumerate(cases):
        k1, k2 = jax.random.split(jax.random.fold_in(key, i))
        x = jax.random.normal(k1, shape, dtype=jnp.float32).astype(dtype)
        y = jax.random.normal(k2, shape, dtype=jnp.float32).astype(dtype)
        loss = jax.block_until_ready(my_loss(x, y, alph))
        ref = jax.block_until_ready(_reference(x, y, alph))
        assert jnp.allclose(loss, ref, rtol=1e-4, atol=1e-5), (shape, dtype, loss, ref)
    print("KERNEL_OK")
</pallas_src>

<mosaic_0001>
module attributes {stable_mosaic.version = 11 : i64} {
  func.func @_sums_kernel(%arg0: i32, %arg1: i32, %arg2: memref<16x512xf32, #tpu.memory_space<vmem>>, %arg3: memref<16x512xf32, #tpu.memory_space<vmem>>, %arg4: memref<1x6x8x512xf32, #tpu.memory_space<vmem>>) attributes {dimension_semantics = [#tpu.dimension_semantics<parallel>, #tpu.dimension_semantics<arbitrary>], iteration_bounds = array<i64: 1, 1>, scalar_prefetch = 0 : i64, scratch_operands = 0 : i64, tpu.core_type = #tpu.core_type<tc>, window_params = [{transform_indices = @transform_0, window_bounds = array<i64: 16, 512>}, {transform_indices = @transform_1, window_bounds = array<i64: 16, 512>}, {transform_indices = @transform_2, window_bounds = array<i64: 1, 6, 8, 512>}]} {
    %c0_i32 = arith.constant 0 : i32
    %0 = arith.cmpi eq, %arg1, %c0_i32 : i32
    %1 = arith.extui %0 : i1 to i32
    %c0_i32_0 = arith.constant 0 : i32
    %2 = arith.cmpi ne, %1, %c0_i32_0 : i32
    scf.if %2 {
      %cst_50 = arith.constant 0.000000e+00 : f32
      %66 = vector.broadcast %cst_50 : f32 to vector<6x8x512xf32>
      %c0_51 = arith.constant 0 : index
      %c0_52 = arith.constant 0 : index
      %c0_53 = arith.constant 0 : index
      %c0_54 = arith.constant 0 : index
      %67 = vector.load %arg4[%c0_51, %c0_52, %c0_53, %c0_54] : memref<1x6x8x512xf32, #tpu.memory_space<vmem>>, vector<1x6x8x512xf32>
      %68 = vector.shape_cast %67 : vector<1x6x8x512xf32> to vector<6x8x512xf32>
      %69 = vector.shape_cast %66 : vector<6x8x512xf32> to vector<1x6x8x512xf32>
      tpu.vector_store %arg4[%c0_51, %c0_52, %c0_53, %c0_54], %69 {strides = array<i32>} : memref<1x6x8x512xf32, #tpu.memory_space<vmem>>, vector<1x6x8x512xf32>,
    } else {
    }
    %cst = arith.constant 0.000000e+00 : f32
    %3 = vector.broadcast %cst : f32 to vector<8x512xf32>
    %c0 = arith.constant 0 : index
    %c0_1 = arith.constant 0 : index
    %4 = vector.load %arg2[%c0, %c0_1] : memref<16x512xf32, #tpu.memory_space<vmem>>, vector<8x512xf32>
    %c0_2 = arith.constant 0 : index
    %c0_3 = arith.constant 0 : index
    %5 = vector.load %arg3[%c0_2, %c0_3] : memref<16x512xf32, #tpu.memory_space<vmem>>, vector<8x512xf32>
    %6 = arith.subf %4, %5 : vector<8x512xf32>
    %7 = arith.mulf %4, %5 : vector<8x512xf32>
    %8 = arith.addf %3, %7 : vector<8x512xf32>
    %9 = arith.addf %3, %4 : vector<8x512xf32>
    %10 = arith.addf %3, %5 : vector<8x512xf32>
    %11 = arith.mulf %4, %4 : vector<8x512xf32>
    %12 = arith.addf %3, %11 : vector<8x512xf32>
    %13 = arith.mulf %5, %5 : vector<8x512xf32>
    %14 = arith.addf %3, %13 : vector<8x512xf32>
    %15 = arith.mulf %6, %6 : vector<8x512xf32>
    %16 = arith.addf %3, %15 : vector<8x512xf32>
    %c8 = arith.constant 8 : index
    %c0_4 = arith.constant 0 : index
    %17 = vector.load %arg2[%c8, %c0_4] : memref<16x512xf32, #tpu.memory_space<vmem>>, vector<8x512xf32>
    %c8_5 = arith.constant 8 : index
    %c0_6 = arith.constant 0 : index
    %18 = vector.load %arg3[%c8_5, %c0_6] : memref<16x512xf32, #tpu.memory_space<vmem>>, vector<8x512xf32>
    %19 = arith.subf %17, %18 : vector<8x512xf32>
    %20 = arith.mulf %17, %18 : vector<8x512xf32>
    %21 = arith.addf %8, %20 : vector<8x512xf32>
    %22 = arith.addf %9, %17 : vector<8x512xf32>
    %23 = arith.addf %10, %18 : vector<8x512xf32>
    %24 = arith.mulf %17, %17 : vector<8x512xf32>
    %25 = arith.addf %12, %24 : vector<8x512xf32>
    %26 = arith.mulf %18, %18 : vector<8x512xf32>
    %27 = arith.addf %14, %26 : vector<8x512xf32>
    %28 = arith.mulf %19, %19 : vector<8x512xf32>
    %29 = arith.addf %16, %28 : vector<8x512xf32>
    %c0_7 = arith.constant 0 : index
    %c0_8 = arith.constant 0 : index
    %c0_9 = arith.constant 0 : index
    %c0_10 = arith.constant 0 : index
    %30 = vector.load %arg4[%c0_7, %c0_8, %c0_9, %c0_10] : memref<1x6x8x512xf32, #tpu.memory_space<vmem>>, vector<1x1x8x512xf32>
    %31 = vector.shape_cast %30 : vector<1x1x8x512xf32> to vector<8x512xf32>
    %32 = arith.addf %31, %21 : vector<8x512xf32>
    %c0_11 = arith.constant 0 : index
    %c0_12 = arith.constant 0 : index
    %c0_13 = arith.constant 0 : index
    %c0_14 = arith.constant 0 : index
    %33 = vector.load %arg4[%c0_11, %c0_12, %c0_13, %c0_14] : memref<1x6x8x512xf32, #tpu.memory_space<vmem>>, vector<1x1x8x512xf32>
    %34 = vector.shape_cast %33 : vector<1x1x8x512xf32> to vector<8x512xf32>
    %35 = vector.shape_cast %32 : vector<8x512xf32> to vector<1x1x8x512xf32>
    tpu.vector_store %arg4[%c0_11, %c0_12, %c0_13, %c0_14], %35 {strides = array<i32>} : memref<1x6x8x512xf32, #tpu.memory_space<vmem>>, vector<1x1x8x512xf32>,
    %c0_15 = arith.constant 0 : index
    %c1 = arith.constant 1 : index
    %c0_16 = arith.constant 0 : index
    %c0_17 = arith.constant 0 : index
    %36 = vector.load %arg4[%c0_15, %c1, %c0_16, %c0_17] : memref<1x6x8x512xf32, #tpu.memory_space<vmem>>, vector<1x1x8x512xf32>
    %37 = vector.shape_cast %36 : vector<1x1x8x512xf32> to vector<8x512xf32>
    %38 = arith.addf %37, %22 : vector<8x512xf32>
    %c0_18 = arith.constant 0 : index
    %c1_19 = arith.constant 1 : index
    %c0_20 = arith.constant 0 : index
    %c0_21 = arith.constant 0 : index
    %39 = vector.load %arg4[%c0_18, %c1_19, %c0_20, %c0_21] : memref<1x6x8x512xf32, #tpu.memory_space<vmem>>, vector<1x1x8x512xf32>
    %40 = vector.shape_cast %39 : vector<1x1x8x512xf32> to vector<8x512xf32>
    %41 = vector.shape_cast %38 : vector<8x512xf32> to vector<1x1x8x512xf32>
    tpu.vector_store %arg4[%c0_18, %c1_19, %c0_20, %c0_21], %41 {strides = array<i32>} : memref<1x6x8x512xf32, #tpu.memory_space<vmem>>, vector<1x1x8x512xf32>,
    %c0_22 = arith.constant 0 : index
    %c2 = arith.constant 2 : index
    %c0_23 = arith.constant 0 : index
    %c0_24 = arith.constant 0 : index
    %42 = vector.load %arg4[%c0_22, %c2, %c0_23, %c0_24] : memref<1x6x8x512xf32, #tpu.memory_space<vmem>>, vector<1x1x8x512xf32>
    %43 = vector.shape_cast %42 : vector<1x1x8x512xf32> to vector<8x512xf32>
    %44 = arith.addf %43, %23 : vector<8x512xf32>
    %c0_25 = arith.constant 0 : index
    %c2_26 = arith.constant 2 : index
    %c0_27 = arith.constant 0 : index
    %c0_28 = arith.constant 0 : index
    %45 = vector.load %arg4[%c0_25, %c2_26, %c0_27, %c0_28] : memref<1x6x8x512xf32, #tpu.memory_space<vmem>>, vector<1x1x8x512xf32>
    %46 = vector.shape_cast %45 : vector<1x1x8x512xf32> to vector<8x512xf32>
    %47 = vector.shape_cast %44 : vector<8x512xf32> to vector<1x1x8x512xf32>
    tpu.vector_store %arg4[%c0_25, %c2_26, %c0_27, %c0_28], %47 {strides = array<i32>} : memref<1x6x8x512xf32, #tpu.memory_space<vmem>>, vector<1x1x8x512xf32>,
    %c0_29 = arith.constant 0 : index
    %c3 = arith.constant 3 : index
    %c0_30 = arith.constant 0 : index
    %c0_31 = arith.constant 0 : index
    %48 = vector.load %arg4[%c0_29, %c3, %c0_30, %c0_31] : memref<1x6x8x512xf32, #tpu.memory_space<vmem>>, vector<1x1x8x512xf32>
    %49 = vector.shape_cast %48 : vector<1x1x8x512xf32> to vector<8x512xf32>
    %50 = arith.addf %49, %25 : vector<8x512xf32>
    %c0_32 = arith.constant 0 : index
    %c3_33 = arith.constant 3 : index
    %c0_34 = arith.constant 0 : index
    %c0_35 = arith.constant 0 : index
    %51 = vector.load %arg4[%c0_32, %c3_33, %c0_34, %c0_35] : memref<1x6x8x512xf32, #tpu.memory_space<vmem>>, vector<1x1x8x512xf32>
    %52 = vector.shape_cast %51 : vector<1x1x8x512xf32> to vector<8x512xf32>
    %53 = vector.shape_cast %50 : vector<8x512xf32> to vector<1x1x8x512xf32>
    tpu.vector_store %arg4[%c0_32, %c3_33, %c0_34, %c0_35], %53 {strides = array<i32>} : memref<1x6x8x512xf32, #tpu.memory_space<vmem>>, vector<1x1x8x512xf32>,
    %c0_36 = arith.constant 0 : index
    %c4 = arith.constant 4 : index
    %c0_37 = arith.constant 0 : index
    %c0_38 = arith.constant 0 : index
    %54 = vector.load %arg4[%c0_36, %c4, %c0_37, %c0_38] : memref<1x6x8x512xf32, #tpu.memory_space<vmem>>, vector<1x1x8x512xf32>
    %55 = vector.shape_cast %54 : vector<1x1x8x512xf32> to vector<8x512xf32>
    %56 = arith.addf %55, %27 : vector<8x512xf32>
    %c0_39 = arith.constant 0 : index
    %c4_40 = arith.constant 4 : index
    %c0_41 = arith.constant 0 : index
    %c0_42 = arith.constant 0 : index
    %57 = vector.load %arg4[%c0_39, %c4_40, %c0_41, %c0_42] : memref<1x6x8x512xf32, #tpu.memory_space<vmem>>, vector<1x1x8x512xf32>
    %58 = vector.shape_cast %57 : vector<1x1x8x512xf32> to vector<8x512xf32>
    %59 = vector.shape_cast %56 : vector<8x512xf32> to vector<1x1x8x512xf32>
    tpu.vector_store %arg4[%c0_39, %c4_40, %c0_41, %c0_42], %59 {strides = array<i32>} : memref<1x6x8x512xf32, #tpu.memory_space<vmem>>, vector<1x1x8x512xf32>,
    %c0_43 = arith.constant 0 : index
    %c5 = arith.constant 5 : index
    %c0_44 = arith.constant 0 : index
    %c0_45 = arith.constant 0 : index
    %60 = vector.load %arg4[%c0_43, %c5, %c0_44, %c0_45] : memref<1x6x8x512xf32, #tpu.memory_space<vmem>>, vector<1x1x8x512xf32>
    %61 = vector.shape_cast %60 : vector<1x1x8x512xf32> to vector<8x512xf32>
    %62 = arith.addf %61, %29 : vector<8x512xf32>
    %c0_46 = arith.constant 0 : index
    %c5_47 = arith.constant 5 : index
    %c0_48 = arith.constant 0 : index
    %c0_49 = arith.constant 0 : index
    %63 = vector.load %arg4[%c0_46, %c5_47, %c0_48, %c0_49] : memref<1x6x8x512xf32, #tpu.memory_space<vmem>>, vector<1x1x8x512xf32>
    %64 = vector.shape_cast %63 : vector<1x1x8x512xf32> to vector<8x512xf32>
    %65 = vector.shape_cast %62 : vector<8x512xf32> to vector<1x1x8x512xf32>
    tpu.vector_store %arg4[%c0_46, %c5_47, %c0_48, %c0_49], %65 {strides = array<i32>} : memref<1x6x8x512xf32, #tpu.memory_space<vmem>>, vector<1x1x8x512xf32>,
    return
  }
  func.func @transform_0(%arg0: i32, %arg1: i32) -> (i32, i32) {
    %c1_i32 = arith.constant 1 : i32
    %0 = arith.muli %arg0, %c1_i32 : i32
    %1 = arith.addi %0, %arg1 : i32
    %c0_i32 = arith.constant 0 : i32
    %2 = arith.minsi %1, %c0_i32 : i32
    %c0_i32_0 = arith.constant 0 : i32
    %c0_i32_1 = arith.constant 0 : i32
    return %2, %c0_i32_0 : i32, i32
  }
  func.func @transform_1(%arg0: i32, %arg1: i32) -> (i32, i32) {
    %c1_i32 = arith.constant 1 : i32
    %0 = arith.muli %arg0, %c1_i32 : i32
    %1 = arith.addi %0, %arg1 : i32
    %c0_i32 = arith.constant 0 : i32
    %2 = arith.minsi %1, %c0_i32 : i32
    %c0_i32_0 = arith.constant 0 : i32
    %c0_i32_1 = arith.constant 0 : i32
    return %2, %c0_i32_0 : i32, i32
  }
  func.func @transform_2(%arg0: i32, %arg1: i32) -> (i32, i32, i32, i32) {
    %c0_i32 = arith.constant 0 : i32
    %c0_i32_0 = arith.constant 0 : i32
    %c0_i32_1 = arith.constant 0 : i32
    %c0_i32_2 = arith.constant 0 : i32
    return %arg0, %c0_i32, %c0_i32_0, %c0_i32_1 : i32, i32, i32, i32
  }
}

</mosaic_0001>

<bundles_post_ra>
// kernel: my_loss.1
= control target key start
LH: loop header
LB: loop body
LE: loop exit
PB: predicated region body
PF: predicated region fallthrough
CT: control target
= control target key end

     0   :  { %s580_s0 = inlined_call_operand.vmem [shape: f32[16,512], index: 0, kind: input, shape index: {}]   ;;  %s581_s1 = inlined_call_operand.vmem [shape: f32[16,512], index: 1, kind: input, shape index: {}]   ;;  %s582_s2 = inlined_call_operand.vmem [shape: f32[1,6,8,512], index: 2, kind: output, shape index: {}]  }
   0x1   :  { %v365_v0 = vld [vmem:[%s580_s0] sm:$0xff]  ;;  %v387_v5 = vld [vmem:[%s580_s0 + $0x8] sm:$0xff]  ;;  %v417_v14 = vld [vmem:[%s580_s0 + $0x10] sm:$0xff] }
   0x2   :  { %v370_v1 = vld [vmem:[%s581_s1] sm:$0xff]  ;;  %v392_v6 = vld [vmem:[%s581_s1 + $0x8] sm:$0xff]  ;;  %v137_v8 = vmul.f32 %v365_v0, %v365_v0  ;;  %v138_v16 = vmul.f32 %v387_v5, %v387_v5  ;;  %v428_v18 = vld [vmem:[%s581_s1 + $0x10] sm:$0xff]  ;;  %v139_v41 = vmul.f32 %v417_v14, %v417_v14 }
   0x3   :  { %v375_v2 = vld [vmem:[%s580_s0 + $0x20] sm:$0xff]  ;;  %v121_v3 = vmul.f32 %v370_v1, %v365_v0  ;;  %v122_v11 = vmul.f32 %v392_v6, %v387_v5  ;;  %v407_v12 = vld [vmem:[%s580_s0 + $0x28] sm:$0xff]  ;;  %v433_v19 = vld [vmem:[%s580_s0 + $0x30] sm:$0xff]  ;;  %v123_v24 = vmul.f32 %v428_v18, %v417_v14  ;;  %v145_v47 = vmul.f32 %v370_v1, %v370_v1 }
   0x4   :  { %v382_v4 = vld [vmem:[%s581_s1 + $0x20] sm:$0xff]  ;;  %v181_v7 = vadd.f32 %v375_v2, %v365_v0  ;;  %v189_v9 = vmul.f32 %v375_v2, %v375_v2  ;;  %v412_v13 = vld [vmem:[%s581_s1 + $0x28] sm:$0xff]  ;;  %v438_v20 = vld [vmem:[%s581_s1 + $0x30] sm:$0xff]  ;;  %v182_v21 = vadd.f32 %v407_v12, %v387_v5  ;;  %v183_v29 = vadd.f32 %v433_v19, %v417_v14 }
   0x5   :  { %v173_v10 = vmul.f32 %v382_v4, %v375_v2  ;;  %v185_v15 = vadd.f32 %v382_v4, %v370_v1  ;;  %v174_v17 = vmul.f32 %v412_v13, %v407_v12  ;;  %v186_v22 = vadd.f32 %v412_v13, %v392_v6  ;;  %v451_v26 = vld [vmem:[%s580_s0 + $0x18] sm:$0xff] }
   0x6   :  { %v175_v25 = vmul.f32 %v438_v20, %v433_v19  ;;  %v116_v27 = vld [vmem:[%s581_s1 + $0x18] sm:$0xff]  ;;  %310 = vst [vmem:[%s582_s2 + $0x20] sm:$0xff] %v181_v7  ;;  %311 = vst [vmem:[%s582_s2 + $0x28] sm:$0xff] %v182_v21  ;;  %v187_v37 = vadd.f32 %v438_v20, %v428_v18  ;;  %v193_v39 = vadd.f32 %v189_v9, %v137_v8 }
   0x7   :  { %v177_v23 = vadd.f32 %v173_v10, %v121_v3  ;;  %v459_v28 = vld [vmem:[%s580_s0 + $0x38] sm:$0xff]  ;;  %v178_v30 = vadd.f32 %v174_v17, %v122_v11  ;;  %v124_v31 = vmul.f32 %v116_v27, %v451_v26  ;;  %312 = vst [vmem:[%s582_s2 + $0x30] sm:$0xff] %v183_v29  ;;  %318 = vst [vmem:[%s582_s2 + $0x40] sm:$0xff] %v185_v15 }
   0x8   :  { %v168_v32 = vld [vmem:[%s581_s1 + $0x38] sm:$0xff]  ;;  %v184_v33 = vadd.f32 %v459_v28, %v451_v26  ;;  %v179_v34 = vadd.f32 %v175_v25, %v123_v24  ;;  %319 = vst [vmem:[%s582_s2 + $0x48] sm:$0xff] %v186_v22  ;;  %v190_v40 = vmul.f32 %v407_v12, %v407_v12  ;;  %v191_v42 = vmul.f32 %v433_v19, %v433_v19 }
   0x9   :  { %v176_v35 = vmul.f32 %v168_v32, %v459_v28  ;;  %221 = vst [vmem:[%s582_s2] sm:$0xff] %v177_v23  ;;  %v188_v38 = vadd.f32 %v168_v32, %v116_v27  ;;  %222 = vst [vmem:[%s582_s2 + $0x8] sm:$0xff] %v178_v30  ;;  %v140_v43 = vmul.f32 %v451_v26, %v451_v26 }
   0xa   :  { %313 = vst [vmem:[%s582_s2 + $0x38] sm:$0xff] %v184_v33  ;;  %223 = vst [vmem:[%s582_s2 + $0x10] sm:$0xff] %v179_v34  ;;  %v194_v44 = vadd.f32 %v190_v40, %v138_v16  ;;  %v195_v45 = vadd.f32 %v191_v42, %v139_v41  ;;  %v192_v46 = vmul.f32 %v459_v28, %v459_v28 }
   0xb   :  { %v180_v36 = vadd.f32 %v176_v35, %v124_v31  ;;  %320 = vst [vmem:[%s582_s2 + $0x50] sm:$0xff] %v187_v37  ;;  %321 = vst [vmem:[%s582_s2 + $0x58] sm:$0xff] %v188_v38  ;;  %v197_v48 = vmul.f32 %v382_v4, %v382_v4  ;;  %v146_v49 = vmul.f32 %v392_v6, %v392_v6 }
   0xc   :  { %v198_v50 = vmul.f32 %v412_v13, %v412_v13  ;;  %326 = vst [vmem:[%s582_s2 + $0x60] sm:$0xff] %v193_v39  ;;  %v196_v51 = vadd.f32 %v192_v46, %v140_v43  ;;  %v147_v52 = vmul.f32 %v428_v18, %v428_v18  ;;  %v199_v55 = vmul.f32 %v438_v20, %v438_v20 }
   0xd   :  { %224 = vst [vmem:[%s582_s2 + $0x18] sm:$0xff] %v180_v36  ;;  %v201_v53 = vadd.f32 %v197_v48, %v145_v47  ;;  %v148_v56 = vmul.f32 %v116_v27, %v116_v27  ;;  %327 = vst [vmem:[%s582_s2 + $0x68] sm:$0xff] %v194_v44  ;;  %v200_v57 = vmul.f32 %v168_v32, %v168_v32 }
   0xe   :  { %v202_v54 = vadd.f32 %v198_v50, %v146_v49  ;;  %328 = vst [vmem:[%s582_s2 + $0x70] sm:$0xff] %v195_v45  ;;  %v117_v58 = vsub.f32 %v365_v0, %v370_v1  ;;  %v169_v59 = vsub.f32 %v375_v2, %v382_v4  ;;  %v203_v60 = vadd.f32 %v199_v55, %v147_v52 }
   0xf   :  { %v118_v61 = vsub.f32 %v387_v5, %v392_v6  ;;  %329 = vst [vmem:[%s582_s2 + $0x78] sm:$0xff] %v196_v51  ;;  %v204_v62 = vadd.f32 %v200_v57, %v148_v56  ;;  %v170_v7 = vsub.f32 %v407_v12, %v412_v13  ;;  %334 = vst [vmem:[%s582_s2 + $0x80] sm:$0xff] %v201_v53 }
  0x10   :  { %v153_v63 = vmul.f32 %v117_v58, %v117_v58  ;;  %v205_v3 = vmul.f32 %v169_v59, %v169_v59  ;;  %335 = vst [vmem:[%s582_s2 + $0x88] sm:$0xff] %v202_v54  ;;  %v119_v1 = vsub.f32 %v417_v14, %v428_v18  ;;  %v171_v2 = vsub.f32 %v433_v19, %v438_v20 }
  0x11   :  { %v154_v0 = vmul.f32 %v118_v61, %v118_v61  ;;  %v206_v5 = vmul.f32 %v170_v7, %v170_v7  ;;  %v120_v6 = vsub.f32 %v451_v26, %v116_v27  ;;  %336 = vst [vmem:[%s582_s2 + $0x90] sm:$0xff] %v203_v60  ;;  %v172_v10 = vsub.f32 %v459_v28, %v168_v32 }
  0x12   :  { %v209_v4 = vadd.f32 %v205_v3, %v153_v63  ;;  %v155_v8 = vmul.f32 %v119_v1, %v119_v1  ;;  %v207_v9 = vmul.f32 %v171_v2, %v171_v2  ;;  %337 = vst [vmem:[%s582_s2 + $0x98] sm:$0xff] %v204_v62 }
  0x13   :  { %v210_v11 = vadd.f32 %v206_v5, %v154_v0  ;;  %v156_v12 = vmul.f32 %v120_v6, %v120_v6  ;;  %v208_v14 = vmul.f32 %v172_v10, %v172_v10 }
  0x14   :  { %v211_v13 = vadd.f32 %v207_v9, %v155_v8  ;;  %342 = vst [vmem:[%s582_s2 + $0xa0] sm:$0xff] %v209_v4 }
  0x15   :  { %v212_v15 = vadd.f32 %v208_v14, %v156_v12  ;;  %343 = vst [vmem:[%s582_s2 + $0xa8] sm:$0xff] %v210_v11 }
  0x16   :  { %344 = vst [vmem:[%s582_s2 + $0xb0] sm:$0xff] %v211_v13 }
  0x17   :  { %345 = vst [vmem:[%s582_s2 + $0xb8] sm:$0xff] %v212_v15 }

</bundles_post_ra>
